<compile_context>
chip_gen: v6e
topology: v6e:2x2x1
jax: 0.10.0
libtpu: 0.0.40
codegen_flags: <defaults>
</compile_context>

<pallas_src>
import functools

import numpy as np
import jax
import jax.numpy as jnp
from jax.experimental import pallas as pl
from jax.experimental.pallas import tpu as pltpu

LN_EPS = 1e-5      # nn.LayerNorm default
LANE = 128
SUBLANE = 8


def _round_up(x, m):
    return ((x + m - 1) // m) * m


def _layernorm_padded(x, gamma, beta, d_true):
    """LayerNorm over the first d_true lanes of a lane-padded activation.

    x is exactly 0 on padded lanes (zero weight columns / zero bias), so the
    mean needs no mask; only the (x - mean)^2 reduction must be masked.
    gamma/beta are zero on padded lanes, so padded output lanes stay exactly 0.
    """
    inv_d = 1.0 / float(d_true)
    mean = jnp.sum(x, axis=-1, keepdims=True) * inv_d
    diff = x - mean
    if x.shape[-1] != d_true:
        lane = jax.lax.broadcasted_iota(jnp.int32, x.shape, dimension=1)
        diff_m = jnp.where(lane < d_true, diff, 0.0)
    else:
        diff_m = diff
    var = jnp.sum(diff_m * diff_m, axis=-1, keepdims=True) * inv_d
    return diff * jax.lax.rsqrt(var + LN_EPS) * gamma + beta


def critic_kernel(
    state_ref, action_ref,
    w1_ref, w2_ref, wa_ref,
    vecs1_ref,          # (3, f1p): [b1, g1, be1]           (f32)
    vecs2_ref,          # (6, f2p): [b2, g2, be2, ba, wq, bq] (f32)
    out_ref,
    *, f1_true, f2_true,
):
    cdt = w1_ref.dtype                      # compute dtype for MXU operands
    x = state_ref[...].astype(cdt)
    a = action_ref[...].astype(cdt)

    b1, g1, be1 = vecs1_ref[0:1, :], vecs1_ref[1:2, :], vecs1_ref[2:3, :]
    b2, g2, be2 = vecs2_ref[0:1, :], vecs2_ref[1:2, :], vecs2_ref[2:3, :]
    ba, wq = vecs2_ref[3:4, :], vecs2_ref[4:5, :]
    bq = vecs2_ref[5:6, 0:LANE]             # bq broadcast across 128 lanes

    # fc1 -> LayerNorm -> ReLU   (weights pre-transposed: x @ W, f32 accumulate)
    sv = jnp.dot(x, w1_ref[...], preferred_element_type=jnp.float32) + b1
    sv = _layernorm_padded(sv, g1, be1, f1_true)
    sv = jnp.maximum(sv, 0.0)

    # fc2 -> LayerNorm -> ReLU
    sv = jnp.dot(sv.astype(cdt), w2_ref[...],
                 preferred_element_type=jnp.float32) + b2
    sv = _layernorm_padded(sv, g2, be2, f2_true)
    sv = jnp.maximum(sv, 0.0)

    # action branch: Linear -> ReLU
    av = jnp.dot(a, wa_ref[...], preferred_element_type=jnp.float32) + ba
    av = jnp.maximum(av, 0.0)

    # combine: relu(sv + av) == sv + av since both operands are already >= 0.
    sav = sv + av

    # q head: N=1 matmul as a VPU row-reduction (MXU stays free), broadcast
    # across 128 lanes -> unmasked lane-dense store.
    q = jnp.sum(sav * wq, axis=-1, keepdims=True)   # (tb, 1)
    out_ref[...] = q + bq                            # (tb, 1) + (1, 128)


def prepare_params(params, compute_dtype=jnp.bfloat16):
    """One-time host-side prep: transpose weights to [in, out], zero-pad every
    feature dim to a multiple of 128 lanes, cast matmul weights to the compute
    dtype, and pack the 1-row vectors into two stacked f32 arrays."""
    fc1_dims, input_dims = params["w1"].shape
    fc2_dims, _ = params["w2"].shape
    _, n_actions = params["wa"].shape

    din = _round_up(input_dims, LANE)
    f1p = _round_up(fc1_dims, LANE)
    f2p = _round_up(fc2_dims, LANE)
    dap = _round_up(n_actions, LANE)

    def pad_t(w, rows, cols):                # [out, in] -> padded [in, out]
        wt = jnp.asarray(w, jnp.float32).T
        out = jnp.zeros((rows, cols), jnp.float32)
        out = out.at[: wt.shape[0], : wt.shape[1]].set(wt)
        return out.astype(compute_dtype)

    def row(v, cols):
        v = jnp.asarray(v, jnp.float32).reshape(-1)
        return jnp.zeros((cols,), jnp.float32).at[: v.shape[0]].set(v)

    vecs1 = jnp.stack([row(params["b1"], f1p),
                       row(params["g1"], f1p),
                       row(params["be1"], f1p)])
    bq_row = jnp.full((f2p,), jnp.asarray(params["bq"], jnp.float32).reshape(()),
                      jnp.float32)
    vecs2 = jnp.stack([row(params["b2"], f2p),
                       row(params["g2"], f2p),
                       row(params["be2"], f2p),
                       row(params["ba"], f2p),
                       row(params["wq"], f2p),
                       bq_row])

    pp = {
        "w1": pad_t(params["w1"], din, f1p),
        "w2": pad_t(params["w2"], f1p, f2p),
        "wa": pad_t(params["wa"], dap, f2p),
        "vecs1": vecs1,
        "vecs2": vecs2,
    }
    meta = dict(input_dims=input_dims, fc1_dims=fc1_dims, fc2_dims=fc2_dims,
                n_actions=n_actions, din=din, f1p=f1p, f2p=f2p, dap=dap)
    return pp, meta


def _batch_tile(batch, block_b):
    """Rows per grid step: at most block_b, but no more than ~half the batch
    (rounded up to a sublane multiple) so mid/large batches give >=2 grid
    steps for v7x's two TensorCores."""
    half = _round_up(max(1, -(-batch // 2)), SUBLANE)
    return max(SUBLANE, min(block_b, half))


def _vmem_limit_bytes(tb, din, dap, f1p, f2p, w_bytes):
    acts_io = 2 * tb * (din + dap + LANE) * 4                   # double-buffered I/O tiles
    weights = 2 * (din * f1p + f1p * f2p + dap * f2p) * w_bytes  # resident (double-buffered)
    vecs = 2 * (3 * f1p + 6 * f2p) * 4
    live = 6 * tb * max(f1p, f2p) * 4                            # in-kernel intermediates
    est = acts_io + weights + vecs + live
    return int(min(64 * 1024 * 1024, max(32 * 1024 * 1024, 2 * est)))


def critic_forward(state, action, pp, meta, block_b=512):
    """state: [B, input_dims], action: [B, n_actions] -> q: [B, 1]."""
    B = state.shape[0]
    din, f1p, f2p, dap = meta["din"], meta["f1p"], meta["f2p"], meta["dap"]

    # Feature-dim-only padding (no batch padding copy; ragged last block is
    # handled by the grid and sliced off). Skipped when already lane-wide.
    sp = state.astype(jnp.float32)
    if sp.shape[1] != din:
        sp = jnp.pad(sp, ((0, 0), (0, din - sp.shape[1])))
    ap = action.astype(jnp.float32)
    if ap.shape[1] != dap:
        ap = jnp.pad(ap, ((0, 0), (0, dap - ap.shape[1])))

    tb = _batch_tile(B, block_b)
    grid = (pl.cdiv(B, tb),)

    kern = functools.partial(critic_kernel,
                             f1_true=meta["fc1_dims"], f2_true=meta["fc2_dims"])

    def act_spec(d):
        return pl.BlockSpec((tb, d), lambda i: (i, 0))

    def resident(shape):
        return pl.BlockSpec(shape, lambda i: (0, 0))   # weights stay resident

    w_bytes = jnp.dtype(pp["w1"].dtype).itemsize
    vlim = _vmem_limit_bytes(tb, din, dap, f1p, f2p, w_bytes)

    out = pl.pallas_call(
        kern,
        out_shape=jax.ShapeDtypeStruct((B, LANE), jnp.float32),
        grid=grid,
        in_specs=[
            act_spec(din), act_spec(dap),
            resident((din, f1p)), resident((f1p, f2p)), resident((dap, f2p)),
            resident((3, f1p)), resident((6, f2p)),
        ],
        out_specs=pl.BlockSpec((tb, LANE), lambda i: (i, 0)),
        compiler_params=pltpu.CompilerParams(
            dimension_semantics=("parallel",),
            vmem_limit_bytes=vlim),
    )(sp, ap, pp["w1"], pp["w2"], pp["wa"], pp["vecs1"], pp["vecs2"])

    return out[:B, 0:1]


def init_params(key, input_dims, fc1_dims, fc2_dims, n_actions):
    """Deterministic init mirroring CriticNetwork.__init__ bounds (PyTorch layout)."""
    ks = jax.random.split(key, 8)
    f1 = 1.0 / np.sqrt(fc1_dims)        # fc1.weight.size()[0] == fc1_dims
    f2 = 1.0 / np.sqrt(fc2_dims)        # fc2.weight.size()[0] == fc2_dims
    fa = 1.0 / np.sqrt(n_actions)       # PyTorch default bound for action_value
    f4 = 0.003
    u = lambda k, shape, b: jax.random.uniform(k, shape, jnp.float32, -b, b)
    return {
        "w1": u(ks[0], (fc1_dims, input_dims), f1),
        "b1": u(ks[1], (1, fc1_dims), f1),
        "g1": jnp.ones((1, fc1_dims), jnp.float32),
        "be1": jnp.zeros((1, fc1_dims), jnp.float32),
        "w2": u(ks[2], (fc2_dims, fc1_dims), f2),
        "b2": u(ks[3], (1, fc2_dims), f2),
        "g2": jnp.ones((1, fc2_dims), jnp.float32),
        "be2": jnp.zeros((1, fc2_dims), jnp.float32),
        "wa": u(ks[4], (fc2_dims, n_actions), fa),
        "ba": u(ks[5], (1, fc2_dims), fa),
        "wq": u(ks[6], (1, fc2_dims), f4),
        "bq": u(ks[7], (1, 1), f4),
    }


if __name__ == "__main__":
    B = 8
    input_dims = 16
    fc1_dims = 32
    fc2_dims = 32
    n_actions = 4

    key = jax.random.PRNGKey(0)
    k_state, k_action, k_params = jax.random.split(key, 3)

    state = jax.random.normal(k_state, (B, input_dims), jnp.float32)
    action = jax.random.normal(k_action, (B, n_actions), jnp.float32)
    params = init_params(k_params, input_dims, fc1_dims, fc2_dims, n_actions)

    # Pure-JAX reference of the same math (unpadded, PyTorch layout).
    def ref(state, action, p):
        def ln(x, g, b):
            m = jnp.mean(x, -1, keepdims=True)
            v = jnp.mean((x - m) ** 2, -1, keepdims=True)
            return (x - m) / jnp.sqrt(v + LN_EPS) * g + b
        sv = state @ p["w1"].T + p["b1"]
        sv = jnp.maximum(ln(sv, p["g1"], p["be1"]), 0.0)
        sv = sv @ p["w2"].T + p["b2"]
        sv = jnp.maximum(ln(sv, p["g2"], p["be2"]), 0.0)
        av = jnp.maximum(action @ p["wa"].T + p["ba"], 0.0)
        sav = jnp.maximum(sv + av, 0.0)
        return sav @ p["wq"].T + p["bq"]

    q_ref = np.asarray(ref(state, action, params))

    # fp32 weight path: matches the reference math tightly.
    pp32, meta = prepare_params(params, compute_dtype=jnp.float32)
    q32 = jax.block_until_ready(critic_forward(state, action, pp32, meta))
    assert q32.shape == (B, 1) and q32.dtype == jnp.float32
    np.testing.assert_allclose(np.asarray(q32), q_ref, rtol=1e-5, atol=1e-5)

    # bf16 weight path (default perf path): f32 accumulation, looser tolerance.
    ppbf, meta = prepare_params(params)   # compute_dtype=bf16 by default
    qbf = jax.block_until_ready(critic_forward(state, action, ppbf, meta))
    assert qbf.shape == (B, 1) and qbf.dtype == jnp.float32
    np.testing.assert_allclose(np.asarray(qbf), q_ref, rtol=5e-2, atol=1e-2)

    print("KERNEL_OK")
</pallas_src>

<mosaic_0001>
module attributes {stable_mosaic.version = 11 : i64} {
  func.func @critic_kernel(%arg0: i32, %arg1: memref<8x128xf32, #tpu.memory_space<vmem>>, %arg2: memref<8x128xf32, #tpu.memory_space<vmem>>, %arg3: memref<128x128xf32, #tpu.memory_space<vmem>>, %arg4: memref<128x128xf32, #tpu.memory_space<vmem>>, %arg5: memref<128x128xf32, #tpu.memory_space<vmem>>, %arg6: memref<3x128xf32, #tpu.memory_space<vmem>>, %arg7: memref<6x128xf32, #tpu.memory_space<vmem>>, %arg8: memref<8x128xf32, #tpu.memory_space<vmem>>) attributes {dimension_semantics = [#tpu.dimension_semantics<parallel>], iteration_bounds = array<i64: 1>, scalar_prefetch = 0 : i64, scratch_operands = 0 : i64, tpu.core_type = #tpu.core_type<tc>, window_params = [{transform_indices = @transform_0, window_bounds = array<i64: 8, 128>}, {transform_indices = @transform_1, window_bounds = array<i64: 8, 128>}, {pipeline_mode = #tpu.pipeline_mode<synchronous>, transform_indices = @transform_2, window_bounds = array<i64: 128, 128>}, {pipeline_mode = #tpu.pipeline_mode<synchronous>, transform_indices = @transform_3, window_bounds = array<i64: 128, 128>}, {pipeline_mode = #tpu.pipeline_mode<synchronous>, transform_indices = @transform_4, window_bounds = array<i64: 128, 128>}, {pipeline_mode = #tpu.pipeline_mode<synchronous>, transform_indices = @transform_5, window_bounds = array<i64: 3, 128>}, {pipeline_mode = #tpu.pipeline_mode<synchronous>, transform_indices = @transform_6, window_bounds = array<i64: 6, 128>}, {transform_indices = @transform_7, window_bounds = array<i64: 8, 128>}]} {
    %c0 = arith.constant 0 : index
    %c0_0 = arith.constant 0 : index
    %0 = vector.load %arg1[%c0, %c0_0] : memref<8x128xf32, #tpu.memory_space<vmem>>, vector<8x128xf32>
    %c0_1 = arith.constant 0 : index
    %c0_2 = arith.constant 0 : index
    %1 = vector.load %arg2[%c0_1, %c0_2] : memref<8x128xf32, #tpu.memory_space<vmem>>, vector<8x128xf32>
    %c0_3 = arith.constant 0 : index
    %c0_4 = arith.constant 0 : index
    %2 = vector.load %arg6[%c0_3, %c0_4] : memref<3x128xf32, #tpu.memory_space<vmem>>, vector<1x128xf32>
    %c1 = arith.constant 1 : index
    %c0_5 = arith.constant 0 : index
    %3 = vector.load %arg6[%c1, %c0_5] : memref<3x128xf32, #tpu.memory_space<vmem>>, vector<1x128xf32>
    %c2 = arith.constant 2 : index
    %c0_6 = arith.constant 0 : index
    %4 = vector.load %arg6[%c2, %c0_6] : memref<3x128xf32, #tpu.memory_space<vmem>>, vector<1x128xf32>
    %c0_7 = arith.constant 0 : index
    %c0_8 = arith.constant 0 : index
    %5 = vector.load %arg7[%c0_7, %c0_8] : memref<6x128xf32, #tpu.memory_space<vmem>>, vector<1x128xf32>
    %c1_9 = arith.constant 1 : index
    %c0_10 = arith.constant 0 : index
    %6 = vector.load %arg7[%c1_9, %c0_10] : memref<6x128xf32, #tpu.memory_space<vmem>>, vector<1x128xf32>
    %c2_11 = arith.constant 2 : index
    %c0_12 = arith.constant 0 : index
    %7 = vector.load %arg7[%c2_11, %c0_12] : memref<6x128xf32, #tpu.memory_space<vmem>>, vector<1x128xf32>
    %c3 = arith.constant 3 : index
    %c0_13 = arith.constant 0 : index
    %8 = vector.load %arg7[%c3, %c0_13] : memref<6x128xf32, #tpu.memory_space<vmem>>, vector<1x128xf32>
    %c4 = arith.constant 4 : index
    %c0_14 = arith.constant 0 : index
    %9 = vector.load %arg7[%c4, %c0_14] : memref<6x128xf32, #tpu.memory_space<vmem>>, vector<1x128xf32>
    %c5 = arith.constant 5 : index
    %c0_15 = arith.constant 0 : index
    %10 = vector.load %arg7[%c5, %c0_15] : memref<6x128xf32, #tpu.memory_space<vmem>>, vector<1x128xf32>
    %c0_16 = arith.constant 0 : index
    %c0_17 = arith.constant 0 : index
    %11 = vector.load %arg3[%c0_16, %c0_17] : memref<128x128xf32, #tpu.memory_space<vmem>>, vector<128x128xf32>
    %cst = arith.constant dense<0.000000e+00> : vector<8x128xf32>
    %12 = tpu.matmul %0, %11, %cst {dimension_numbers = #tpu.dot_dimension_numbers<[1], [0], [0], [1], [0, 0, 1, 1], [], []>} : vector<8x128xf32>, vector<128x128xf32>, vector<8x128xf32> -> vector<8x128xf32>
    %13 = vector.broadcast %2 : vector<1x128xf32> to vector<8x128xf32>
    %14 = arith.addf %12, %13 : vector<8x128xf32>
    %cst_18 = arith.constant dense<0.000000e+00> : vector<8xf32>
    %15 = vector.multi_reduction <add>, %14, %cst_18 [1] : vector<8x128xf32> to vector<8xf32>
    %16 = vector.shape_cast %15 : vector<8xf32> to vector<8x1xf32>
    %cst_19 = arith.constant 3.125000e-02 : f32
    %17 = vector.broadcast %cst_19 : f32 to vector<8x1xf32>
    %18 = arith.mulf %16, %17 : vector<8x1xf32>
    %19 = vector.broadcast %18 : vector<8x1xf32> to vector<8x128xf32>
    %20 = arith.subf %14, %19 : vector<8x128xf32>
    %21 = tpu.iota {dimensions = array<i32: 1>} : vector<8x128xi32>
    %c32_i32 = arith.constant 32 : i32
    %22 = vector.broadcast %c32_i32 : i32 to vector<8x128xi32>
    %23 = arith.cmpi slt, %21, %22 : vector<8x128xi32>
    %cst_20 = arith.constant 0.000000e+00 : f32
    %24 = vector.broadcast %cst_20 : f32 to vector<8x128xf32>
    %25 = arith.select %23, %20, %24 : vector<8x128xi1>, vector<8x128xf32>
    %26 = arith.mulf %25, %25 : vector<8x128xf32>
    %cst_21 = arith.constant dense<0.000000e+00> : vector<8xf32>
    %27 = vector.multi_reduction <add>, %26, %cst_21 [1] : vector<8x128xf32> to vector<8xf32>
    %28 = vector.shape_cast %27 : vector<8xf32> to vector<8x1xf32>
    %cst_22 = arith.constant 3.125000e-02 : f32
    %29 = vector.broadcast %cst_22 : f32 to vector<8x1xf32>
    %30 = arith.mulf %28, %29 : vector<8x1xf32>
    %cst_23 = arith.constant 9.99999974E-6 : f32
    %31 = vector.broadcast %cst_23 : f32 to vector<8x1xf32>
    %32 = arith.addf %30, %31 : vector<8x1xf32>
    %33 = math.rsqrt %32 : vector<8x1xf32>
    %34 = vector.broadcast %33 : vector<8x1xf32> to vector<8x128xf32>
    %35 = arith.mulf %20, %34 : vector<8x128xf32>
    %36 = vector.broadcast %3 : vector<1x128xf32> to vector<8x128xf32>
    %37 = arith.mulf %35, %36 : vector<8x128xf32>
    %38 = vector.broadcast %4 : vector<1x128xf32> to vector<8x128xf32>
    %39 = arith.addf %37, %38 : vector<8x128xf32>
    %cst_24 = arith.constant 0.000000e+00 : f32
    %40 = vector.broadcast %cst_24 : f32 to vector<8x128xf32>
    %41 = arith.maximumf %39, %40 : vector<8x128xf32>
    %c0_25 = arith.constant 0 : index
    %c0_26 = arith.constant 0 : index
    %42 = vector.load %arg4[%c0_25, %c0_26] : memref<128x128xf32, #tpu.memory_space<vmem>>, vector<128x128xf32>
    %cst_27 = arith.constant dense<0.000000e+00> : vector<8x128xf32>
    %43 = tpu.matmul %41, %42, %cst_27 {dimension_numbers = #tpu.dot_dimension_numbers<[1], [0], [0], [1], [0, 0, 1, 1], [], []>} : vector<8x128xf32>, vector<128x128xf32>, vector<8x128xf32> -> vector<8x128xf32>
    %44 = vector.broadcast %5 : vector<1x128xf32> to vector<8x128xf32>
    %45 = arith.addf %43, %44 : vector<8x128xf32>
    %cst_28 = arith.constant dense<0.000000e+00> : vector<8xf32>
    %46 = vector.multi_reduction <add>, %45, %cst_28 [1] : vector<8x128xf32> to vector<8xf32>
    %47 = vector.shape_cast %46 : vector<8xf32> to vector<8x1xf32>
    %cst_29 = arith.constant 3.125000e-02 : f32
    %48 = vector.broadcast %cst_29 : f32 to vector<8x1xf32>
    %49 = arith.mulf %47, %48 : vector<8x1xf32>
    %50 = vector.broadcast %49 : vector<8x1xf32> to vector<8x128xf32>
    %51 = arith.subf %45, %50 : vector<8x128xf32>
    %52 = tpu.iota {dimensions = array<i32: 1>} : vector<8x128xi32>
    %c32_i32_30 = arith.constant 32 : i32
    %53 = vector.broadcast %c32_i32_30 : i32 to vector<8x128xi32>
    %54 = arith.cmpi slt, %52, %53 : vector<8x128xi32>
    %cst_31 = arith.constant 0.000000e+00 : f32
    %55 = vector.broadcast %cst_31 : f32 to vector<8x128xf32>
    %56 = arith.select %54, %51, %55 : vector<8x128xi1>, vector<8x128xf32>
    %57 = arith.mulf %56, %56 : vector<8x128xf32>
    %cst_32 = arith.constant dense<0.000000e+00> : vector<8xf32>
    %58 = vector.multi_reduction <add>, %57, %cst_32 [1] : vector<8x128xf32> to vector<8xf32>
    %59 = vector.shape_cast %58 : vector<8xf32> to vector<8x1xf32>
    %cst_33 = arith.constant 3.125000e-02 : f32
    %60 = vector.broadcast %cst_33 : f32 to vector<8x1xf32>
    %61 = arith.mulf %59, %60 : vector<8x1xf32>
    %cst_34 = arith.constant 9.99999974E-6 : f32
    %62 = vector.broadcast %cst_34 : f32 to vector<8x1xf32>
    %63 = arith.addf %61, %62 : vector<8x1xf32>
    %64 = math.rsqrt %63 : vector<8x1xf32>
    %65 = vector.broadcast %64 : vector<8x1xf32> to vector<8x128xf32>
    %66 = arith.mulf %51, %65 : vector<8x128xf32>
    %67 = vector.broadcast %6 : vector<1x128xf32> to vector<8x128xf32>
    %68 = arith.mulf %66, %67 : vector<8x128xf32>
    %69 = vector.broadcast %7 : vector<1x128xf32> to vector<8x128xf32>
    %70 = arith.addf %68, %69 : vector<8x128xf32>
    %cst_35 = arith.constant 0.000000e+00 : f32
    %71 = vector.broadcast %cst_35 : f32 to vector<8x128xf32>
    %72 = arith.maximumf %70, %71 : vector<8x128xf32>
    %c0_36 = arith.constant 0 : index
    %c0_37 = arith.constant 0 : index
    %73 = vector.load %arg5[%c0_36, %c0_37] : memref<128x128xf32, #tpu.memory_space<vmem>>, vector<128x128xf32>
    %cst_38 = arith.constant dense<0.000000e+00> : vector<8x128xf32>
    %74 = tpu.matmul %1, %73, %cst_38 {dimension_numbers = #tpu.dot_dimension_numbers<[1], [0], [0], [1], [0, 0, 1, 1], [], []>} : vector<8x128xf32>, vector<128x128xf32>, vector<8x128xf32> -> vector<8x128xf32>
    %75 = vector.broadcast %8 : vector<1x128xf32> to vector<8x128xf32>
    %76 = arith.addf %74, %75 : vector<8x128xf32>
    %cst_39 = arith.constant 0.000000e+00 : f32
    %77 = vector.broadcast %cst_39 : f32 to vector<8x128xf32>
    %78 = arith.maximumf %76, %77 : vector<8x128xf32>
    %79 = arith.addf %72, %78 : vector<8x128xf32>
    %80 = vector.broadcast %9 : vector<1x128xf32> to vector<8x128xf32>
    %81 = arith.mulf %79, %80 : vector<8x128xf32>
    %cst_40 = arith.constant dense<0.000000e+00> : vector<8xf32>
    %82 = vector.multi_reduction <add>, %81, %cst_40 [1] : vector<8x128xf32> to vector<8xf32>
    %83 = vector.shape_cast %82 : vector<8xf32> to vector<8x1xf32>
    %84 = vector.broadcast %83 : vector<8x1xf32> to vector<8x128xf32>
    %85 = vector.broadcast %10 : vector<1x128xf32> to vector<8x128xf32>
    %86 = arith.addf %84, %85 : vector<8x128xf32>
    %c0_41 = arith.constant 0 : index
    %c0_42 = arith.constant 0 : index
    %87 = vector.load %arg8[%c0_41, %c0_42] : memref<8x128xf32, #tpu.memory_space<vmem>>, vector<8x128xf32>
    tpu.vector_store %arg8[%c0_41, %c0_42], %86 {strides = array<i32>} : memref<8x128xf32, #tpu.memory_space<vmem>>, vector<8x128xf32>,
    return
  }
  func.func @transform_0(%arg0: i32) -> (i32, i32) {
    %c0_i32 = arith.constant 0 : i32
    %c0_i32_0 = arith.constant 0 : i32
    return %arg0, %c0_i32 : i32, i32
  }
  func.func @transform_1(%arg0: i32) -> (i32, i32) {
    %c0_i32 = arith.constant 0 : i32
    %c0_i32_0 = arith.constant 0 : i32
    return %arg0, %c0_i32 : i32, i32
  }
  func.func @transform_2(%arg0: i32) -> (i32, i32) {
    %c0_i32 = arith.constant 0 : i32
    %c0_i32_0 = arith.constant 0 : i32
    %c0_i32_1 = arith.constant 0 : i32
    return %c0_i32, %c0_i32_0 : i32, i32
  }
  func.func @transform_3(%arg0: i32) -> (i32, i32) {
    %c0_i32 = arith.constant 0 : i32
    %c0_i32_0 = arith.constant 0 : i32
    %c0_i32_1 = arith.constant 0 : i32
    return %c0_i32, %c0_i32_0 : i32, i32
  }
  func.func @transform_4(%arg0: i32) -> (i32, i32) {
    %c0_i32 = arith.constant 0 : i32
    %c0_i32_0 = arith.constant 0 : i32
    %c0_i32_1 = arith.constant 0 : i32
    return %c0_i32, %c0_i32_0 : i32, i32
  }
  func.func @transform_5(%arg0: i32) -> (i32, i32) {
    %c0_i32 = arith.constant 0 : i32
    %c0_i32_0 = arith.constant 0 : i32
    %c0_i32_1 = arith.constant 0 : i32
    return %c0_i32, %c0_i32_0 : i32, i32
  }
  func.func @transform_6(%arg0: i32) -> (i32, i32) {
    %c0_i32 = arith.constant 0 : i32
    %c0_i32_0 = arith.constant 0 : i32
    %c0_i32_1 = arith.constant 0 : i32
    return %c0_i32, %c0_i32_0 : i32, i32
  }
  func.func @transform_7(%arg0: i32) -> (i32, i32) {
    %c0_i32 = arith.constant 0 : i32
    %c0_i32_0 = arith.constant 0 : i32
    return %arg0, %c0_i32 : i32, i32
  }
}

</mosaic_0001>

<bundles_post_ra>
// kernel: tpu_custom_call.1
= control target key start
LH: loop header
LB: loop body
LE: loop exit
PB: predicated region body
PF: predicated region fallthrough
CT: control target
= control target key end

     0   :  { %12 = vsyncpa [#allocation3], 0  ;;  %s956_s0 = inlined_call_operand.hbm [shape: f32[8,128], index: 0, kind: input, shape index: {}]   ;;  %s957_s1 = inlined_call_operand.hbm [shape: f32[8,128], index: 1, kind: input, shape index: {}]   ;;  %s958_s2 = inlined_call_operand.hbm [shape: f32[128,128], index: 2, kind: input, shape index: {}]   ;;  %s959_s3 = inlined_call_operand.hbm [shape: f32[128,128], index: 3, kind: input, shape index: {}]   ;;  %s960_s4 = inlined_call_operand.hbm [shape: f32[128,128], index: 4, kind: input, shape index: {}]   ;;  %s961_s5 = inlined_call_operand.hbm [shape: f32[3,128], index: 5, kind: input, shape index: {}]   ;;  %s962_s6 = inlined_call_operand.vmem [shape: f32[6,128], index: 6, kind: input, shape index: {}]   ;;  %s963_s7 = inlined_call_operand.hbm [shape: f32[8,128], index: 7, kind: output, shape index: {}]  }
   0x1   :  { %13 = vsyncpa [#allocation6], 0 }
   0x2   :  { %14 = vsyncpa [#allocation9], 0 }
   0x3   :  { %15 = vsyncpa [#allocation12], 0 }
   0x4   :  { %16 = vsyncpa [#allocation4], 0  ;;  %s796_s24 = smov [#allocation5]  }
   0x5   :  { %s33_s25 = sshll.u32 %s796_s24, 4  ;;  %s34_s25 = int_to_ptr.vmem [resolvable:$true] %s33_s25 }
   0x6   :  { %s654_s26 = scalar_lea.vmem %s34_s25, 128  ;;  %p659_p1 = scmp.lt.s32.totalorder %s34_s25, %s34_s25 }
   0x7   :  { %p655_p0 = scmp.ne.s32.totalorder %s34_s25, %s654_s26  ;;  %p660_p2 = scmp.lt.s32.totalorder %s654_s26, %s654_s26 }
   0x9   :  { %p661_p3 = por %p660_p2, %p659_p1 }
   0xb   :  { %p662_p4 = pnand %p661_p3, %p655_p0 }
   0xd   :  { %665 = shalt.err (!%p662_p4)
}
   0xe   :  { %36 = dma.hbm_to_vmem [thread:$0]  %s957_s1, 128, %s34_s25, [#allocation6]  }
   0xf   :  { %s797_s29 = smov [#allocation8]   ;;  %s798_s8 = smov [#allocation2]  }
  0x10   :  { %s54_s30 = sshll.u32 %s797_s29, 4  ;;  %s23_s9 = sshll.u32 %s798_s8, 4  ;;  %s55_s30 = int_to_ptr.vmem [resolvable:$true] %s54_s30  ;;  %s24_s9 = int_to_ptr.vmem [resolvable:$true] %s23_s9 }
  0x11   :  { %s674_s10 = scalar_lea.vmem %s55_s30, 2048  ;;  %p679_p6 = scmp.lt.s32.totalorder %s55_s30, %s55_s30 }
  0x12   :  { %p675_p5 = scmp.ne.s32.totalorder %s55_s30, %s674_s10  ;;  %p680_p7 = scmp.lt.s32.totalorder %s674_s10, %s674_s10 }
  0x14   :  { %p681_p8 = por %p680_p7, %p679_p6 }
  0x16   :  { %p682_p9 = pnand %p681_p8, %p675_p5 }
  0x18   :  { %685 = shalt.err (!%p682_p9)
}
  0x19   :  { %s799_s11 = smov 128   ;;  %s800_s12 = smov 8  }
  0x1a   :  { %60 = dma.hbm_to_vmem [thread:$0]  %s959_s3, 2048, %s55_s30, [#allocation9], %s799_s11, %s799_s11, %s800_s12  }
  0x1b   :  { %s694_s1 = scalar_lea.vmem %s24_s9, 128  ;;  %p699_p11 = scmp.lt.s32.totalorder %s24_s9, %s24_s9 }
  0x1c   :  { %p695_p10 = scmp.ne.s32.totalorder %s24_s9, %s694_s1  ;;  %p700_p12 = scmp.lt.s32.totalorder %s694_s1, %s694_s1 }
  0x1e   :  { %p701_p13 = por %p700_p12, %p699_p11 }
  0x20   :  { %p702_p0 = pnand %p701_p13, %p695_p10 }
  0x22   :  { %705 = shalt.err (!%p702_p0)
}
  0x23   :  { %26 = dma.hbm_to_vmem [thread:$0]  %s956_s0, 128, %s24_s9, [#allocation3]  }
  0x24   :  { %s801_s17 = smov [#allocation7]   ;;  %s802_s19 = smov [#allocation10]  }
  0x25   :  { %s42_s18 = sshll.u32 %s801_s17, 4  ;;  %s66_s20 = sshll.u32 %s802_s19, 4  ;;  %s43_s18 = int_to_ptr.vmem [resolvable:$true] %s42_s18  ;;  %s67_s20 = int_to_ptr.vmem [resolvable:$true] %s66_s20 }
  0x26   :  { %s714_s21 = scalar_lea.vmem %s43_s18, 2048  ;;  %p719_p2 = scmp.lt.s32.totalorder %s43_s18, %s43_s18 }
  0x27   :  { %p715_p1 = scmp.ne.s32.totalorder %s43_s18, %s714_s21  ;;  %p720_p3 = scmp.lt.s32.totalorder %s714_s21, %s714_s21 }
  0x29   :  { %p721_p4 = por %p720_p3, %p719_p2 }
  0x2b   :  { %p722_p5 = pnand %p721_p4, %p715_p1 }
  0x2d   :  { %725 = shalt.err (!%p722_p5)
}
  0x2e   :  { %48 = dma.hbm_to_vmem [thread:$0]  %s958_s2, 2048, %s43_s18, [#allocation6], %s799_s11, %s799_s11, %s800_s12  }
  0x2f   :  { %s734_s0 = scalar_lea.vmem %s67_s20, 2048  ;;  %p739_p7 = scmp.lt.s32.totalorder %s67_s20, %s67_s20 }
  0x30   :  { %p735_p6 = scmp.ne.s32.totalorder %s67_s20, %s734_s0  ;;  %p740_p8 = scmp.lt.s32.totalorder %s734_s0, %s734_s0 }
  0x32   :  { %p741_p9 = por %p740_p8, %p739_p7 }
  0x34   :  { %p742_p10 = pnand %p741_p9, %p735_p6 }
  0x36   :  { %745 = shalt.err (!%p742_p10)
}
  0x37   :  { %72 = dma.hbm_to_vmem [thread:$0]  %s960_s4, 2048, %s67_s20, [#allocation9], %s799_s11, %s799_s11, %s800_s12  }
  0x38   :  { %s803_s25 = smov [#allocation11]  }
  0x39   :  { %s79_s26 = sshll.u32 %s803_s25, 4  ;;  %s80_s26 = int_to_ptr.vmem [resolvable:$true] %s79_s26 }
  0x3a   :  { %s754_s27 = scalar_lea.vmem %s80_s26, 64  ;;  %p759_p12 = scmp.lt.s32.totalorder %s80_s26, %s80_s26 }
  0x3b   :  { %p755_p11 = scmp.ne.s32.totalorder %s80_s26, %s754_s27  ;;  %p760_p13 = scmp.lt.s32.totalorder %s754_s27, %s754_s27 }
  0x3d   :  { %p761_p0 = por %p760_p13, %p759_p12 }
  0x3f   :  { %p762_p1 = pnand %p761_p0, %p755_p11 }
  0x41   :  { %765 = shalt.err (!%p762_p1)
}
  0x42   :  { %82 = dma.hbm_to_vmem [thread:$0]  %s961_s5, 64, %s80_s26, [#allocation12]  }
  0x43   :  { %786 = dma.done.wait [#allocation3], 128  }
  0x44   :  { %787 = vsyncadd [#allocation3], 4294967168 }
  0x45   :  { %788 = dma.done.wait [#allocation6], 2176  }
  0x46   :  { %789 = vsyncadd [#allocation6], 4294965120 }
  0x47   :  { %790 = dma.done.wait [#allocation9], 4096  }
  0x48   :  { %791 = vsyncadd [#allocation9], 4294963200 }
  0x49   :  { %792 = dma.done.wait [#allocation12], 64  }
  0x4a   :  { %793 = vsyncadd [#allocation12], 4294967232  ;;  %v804_v0 = vmov 0.0   ;;  %vm805_vm0 = vmmov 0   ;;  %v129_v1 = vld [vmem:[#allocation7 + $0x78] sm:$0xff]  ;;  %v128_v2 = vld [vmem:[#allocation7 + $0x70] sm:$0xff]  ;;  %v208_v25 = vlaneseq }
  0x4b   :  { %526 = vmatprep.subr.mxu0 %v804_v0  ;;  %558 = vmatprep.mubr.msk.f32.mxu0 %vm805_vm0, %v804_v0  ;;  %v127_v3 = vld [vmem:[#allocation7 + $0x68] sm:$0xff]  ;;  %v126_v4 = vld [vmem:[#allocation7 + $0x60] sm:$0xff]  ;;  %v125_v5 = vld [vmem:[#allocation7 + $0x58] sm:$0xff]  ;;  %s806_s15 = smov [#allocation13]  }
  0x4c   :  { %561 = vmatprep.subr.mxu1 %v804_v0  ;;  %593 = vmatprep.mubr.msk.f32.mxu1 %vm805_vm0, %v804_v0  ;;  %v124_v6 = vld [vmem:[#allocation7 + $0x50] sm:$0xff]  ;;  %v123_v7 = vld [vmem:[#allocation7 + $0x48] sm:$0xff]  ;;  %v122_v8 = vld [vmem:[#allocation7 + $0x40] sm:$0xff]  ;;  %v901_v26 = vand.u32 127, %v208_v25  ;;  %s454_s16 = sshll.u32 %s806_s15, 4  ;;  %s455_s16 = int_to_ptr.vmem [resolvable:$true] %s454_s16 }
  0x4d   :  { %527 = vmatpush3.msra.mxu0 %v129_v1  ;;  %v121_v9 = vld [vmem:[#allocation7 + $0x38] sm:$0xff]  ;;  %v120_v10 = vld [vmem:[#allocation7 + $0x30] sm:$0xff]  ;;  %v119_v11 = vld [vmem:[#allocation7 + $0x28] sm:$0xff]  ;;  %s766_s17 = scalar_lea.vmem %s455_s16, 128  ;;  %p771_p3 = scmp.lt.s32.totalorder %s455_s16, %s455_s16 }
  0x4e   :  { %528 = vmatprep.subr.mxu0 %v804_v0  ;;  %v118_v12 = vld [vmem:[#allocation7 + $0x20] sm:$0xff]  ;;  %v117_v13 = vld [vmem:[#allocation7 + $0x18] sm:$0xff]  ;;  %v116_v14 = vld [vmem:[#allocation7 + $0x10] sm:$0xff]  ;;  %vm210_vm1 = vcmp.lt.s32.totalorder %v901_v26, 32  ;;  %p767_p2 = scmp.ne.s32.totalorder %s455_s16, %s766_s17  ;;  %p772_p4 = scmp.lt.s32.totalorder %s766_s17, %s766_s17 }
  0x4f   :  { %529 = vmatpush3.msra.mxu0 %v128_v2  ;;  %v115_v15 = vld [vmem:[#allocation7 + $0x8] sm:$0xff]  ;;  %v114_v16 = vld [vmem:[#allocation7] sm:$0xff]  ;;  %v103_v17 = vld [vmem:[#allocation2] sm:$0xff] }
  0x50   :  { %530 = vmatprep.subr.mxu0 %v804_v0  ;;  %v466_v18 = vld [vmem:[#allocation11] ss:$0 sm:$0xff]  ;;  %v245_v22 = vld [vmem:[#allocation8 + $0x78] sm:$0xff]  ;;  %v244_v23 = vld [vmem:[#allocation8 + $0x70] sm:$0xff]  ;;  %p773_p5 = por %p772_p4, %p771_p3 }
  0x51   :  { %531 = vmatpush3.msra.mxu0 %v127_v3  ;;  %562 = vmatpush3.msra.mxu1 %v245_v22  ;;  %v243_v24 = vld [vmem:[#allocation8 + $0x68] sm:$0xff]  ;;  %v242_v32 = vld [vmem:[#allocation8 + $0x60] sm:$0xff]  ;;  %v241_v33 = vld [vmem:[#allocation8 + $0x58] sm:$0xff] }
  0x52   :  { %532 = vmatprep.subr.mxu0 %v804_v0  ;;  %563 = vmatprep.subr.mxu1 %v804_v0  ;;  %v240_v34 = vld [vmem:[#allocation8 + $0x50] sm:$0xff]  ;;  %v239_v35 = vld [vmem:[#allocation8 + $0x48] sm:$0xff]  ;;  %v238_v36 = vld [vmem:[#allocation8 + $0x40] sm:$0xff]  ;;  %p774_p6 = pnand %p773_p5, %p767_p2 }
  0x53   :  { %533 = vmatpush3.msra.mxu0 %v126_v4  ;;  %564 = vmatpush3.msra.mxu1 %v244_v23  ;;  %v237_v37 = vld [vmem:[#allocation8 + $0x38] sm:$0xff]  ;;  %v236_v38 = vld [vmem:[#allocation8 + $0x30] sm:$0xff]  ;;  %v235_v39 = vld [vmem:[#allocation8 + $0x28] sm:$0xff] }
  0x54   :  { %534 = vmatprep.subr.mxu0 %v804_v0  ;;  %565 = vmatprep.subr.mxu1 %v804_v0  ;;  %v234_v40 = vld [vmem:[#allocation8 + $0x20] sm:$0xff]  ;;  %v233_v41 = vld [vmem:[#allocation8 + $0x18] sm:$0xff]  ;;  %v232_v42 = vld [vmem:[#allocation8 + $0x10] sm:$0xff] }
  0x55   :  { %535 = vmatpush3.msra.mxu0 %v125_v5  ;;  %566 = vmatpush3.msra.mxu1 %v243_v24  ;;  %v231_v43 = vld [vmem:[#allocation8 + $0x8] sm:$0xff]  ;;  %v230_v44 = vld [vmem:[#allocation8] sm:$0xff]  ;;  %v358_v55 = vld [vmem:[#allocation10 + $0x78] sm:$0xff] }
  0x56   :  { %536 = vmatprep.subr.mxu0 %v804_v0  ;;  %567 = vmatprep.subr.mxu1 %v804_v0  ;;  %v467_v49 = vld [vmem:[#allocation11 + $0x1] ss:$0 sm:$0xff]  ;;  %v468_v51 = vld [vmem:[#allocation11 + $0x2] ss:$0 sm:$0xff]  ;;  %v357_v56 = vld [vmem:[#allocation10 + $0x70] sm:$0xff] }
  0x57   :  { %537 = vmatpush3.msra.mxu0 %v124_v6  ;;  %568 = vmatpush3.msra.mxu1 %v242_v32  ;;  %v356_v57 = vld [vmem:[#allocation10 + $0x68] sm:$0xff]  ;;  %v355_v58 = vld [vmem:[#allocation10 + $0x60] sm:$0xff]  ;;  %v354_v59 = vld [vmem:[#allocation10 + $0x58] sm:$0xff] }
  0x58   :  { %538 = vmatprep.subr.mxu0 %v804_v0  ;;  %569 = vmatprep.subr.mxu1 %v804_v0  ;;  %v353_v60 = vld [vmem:[#allocation10 + $0x50] sm:$0xff]  ;;  %v352_v61 = vld [vmem:[#allocation10 + $0x48] sm:$0xff]  ;;  %v351_v62 = vld [vmem:[#allocation10 + $0x40] sm:$0xff] }
  0x59   :  { %539 = vmatpush3.msra.mxu0 %v123_v7  ;;  %570 = vmatpush3.msra.mxu1 %v241_v33  ;;  %v350_v63 = vld [vmem:[#allocation10 + $0x38] sm:$0xff]  ;;  %v349_v1 = vld [vmem:[#allocation10 + $0x30] sm:$0xff]  ;;  %v348_v2 = vld [vmem:[#allocation10 + $0x28] sm:$0xff] }
  0x5a   :  { %540 = vmatprep.subr.mxu0 %v804_v0  ;;  %571 = vmatprep.subr.mxu1 %v804_v0  ;;  %v347_v3 = vld [vmem:[#allocation10 + $0x20] sm:$0xff]  ;;  %v346_v4 = vld [vmem:[#allocation10 + $0x18] sm:$0xff]  ;;  %v345_v5 = vld [vmem:[#allocation10 + $0x10] sm:$0xff] }
  0x5b   :  { %541 = vmatpush3.msra.mxu0 %v122_v8  ;;  %572 = vmatpush3.msra.mxu1 %v240_v34  ;;  %v344_v6 = vld [vmem:[#allocation10 + $0x8] sm:$0xff]  ;;  %v343_v7 = vld [vmem:[#allocation10] sm:$0xff]  ;;  %v104_v8 = vld [vmem:[#allocation5] sm:$0xff] }
  0x5c   :  { %542 = vmatprep.subr.mxu0 %v804_v0  ;;  %573 = vmatprep.subr.mxu1 %v804_v0  ;;  %v472_v22 = vld [vmem:[%s962_s6 + $0x3] ss:$0 sm:$0xff]  ;;  %v470_v24 = vld [vmem:[%s962_s6 + $0x1] ss:$0 sm:$0xff]  ;;  %v473_v32 = vld [vmem:[%s962_s6 + $0x4] ss:$0 sm:$0xff] }
  0x5d   :  { %543 = vmatpush3.msra.mxu0 %v121_v9  ;;  %574 = vmatpush3.msra.mxu1 %v239_v35  ;;  %v469_v9 = vld [vmem:[%s962_s6] ss:$0 sm:$0xff]  ;;  %v474_v35 = vld [vmem:[%s962_s6 + $0x5] ss:$0 sm:$0xff] }
  0x5e   :  { %544 = vmatprep.subr.mxu0 %v804_v0  ;;  %575 = vmatprep.subr.mxu1 %v804_v0 }
  0x5f   :  { %545 = vmatpush3.msra.mxu0 %v120_v10  ;;  %576 = vmatpush3.msra.mxu1 %v238_v36 }
  0x60   :  { %546 = vmatprep.subr.mxu0 %v804_v0  ;;  %577 = vmatprep.subr.mxu1 %v804_v0 }
  0x61   :  { %547 = vmatpush3.msra.mxu0 %v119_v11  ;;  %578 = vmatpush3.msra.mxu1 %v237_v37 }
  0x62   :  { %548 = vmatprep.subr.mxu0 %v804_v0  ;;  %579 = vmatprep.subr.mxu1 %v804_v0 }
  0x63   :  { %549 = vmatpush3.msra.mxu0 %v118_v12  ;;  %580 = vmatpush3.msra.mxu1 %v236_v38 }
  0x64   :  { %550 = vmatprep.subr.mxu0 %v804_v0  ;;  %581 = vmatprep.subr.mxu1 %v804_v0 }
  0x65   :  { %551 = vmatpush3.msra.mxu0 %v117_v13  ;;  %582 = vmatpush3.msra.mxu1 %v235_v39 }
  0x66   :  { %552 = vmatprep.subr.mxu0 %v804_v0  ;;  %583 = vmatprep.subr.mxu1 %v804_v0 }
  0x67   :  { %553 = vmatpush3.msra.mxu0 %v116_v14  ;;  %584 = vmatpush3.msra.mxu1 %v234_v40 }
  0x68   :  { %554 = vmatprep.subr.mxu0 %v804_v0  ;;  %585 = vmatprep.subr.mxu1 %v804_v0 }
  0x69   :  { %555 = vmatpush3.msra.mxu0 %v115_v15  ;;  %586 = vmatpush3.msra.mxu1 %v233_v41 }
  0x6a   :  { %556 = vmatprep.subr.mxu0 %v804_v0  ;;  %587 = vmatprep.subr.mxu1 %v804_v0 }
  0x6b   :  { %557 = vmatpush3.msra.mxu0 %v114_v16  ;;  %588 = vmatpush3.msra.mxu1 %v232_v42 }
  0x6c   :  { %559 = vmatmul.mubr.f32.vlgmr.msra.gmra.mxu0 %v103_v17  ;;  %596 = vmatprep.subr.mxu0 %v804_v0 }
  0x6d   :  { %628 = vmatprep.mubr.msk.f32.mxu0 %vm805_vm0, %v804_v0  ;;  %589 = vmatprep.subr.mxu1 %v804_v0 }
  0x6e   :  { %590 = vmatpush3.msra.mxu1 %v231_v43  ;;  %597 = vmatpush3.msra.mxu0 %v358_v55 }
  0x6f   :  { %591 = vmatprep.subr.mxu1 %v804_v0  ;;  %598 = vmatprep.subr.mxu0 %v804_v0 }
  0x70   :  { %592 = vmatpush3.msra.mxu1 %v230_v44  ;;  %599 = vmatpush3.msra.mxu0 %v357_v56 }
  0x71   :  { %600 = vmatprep.subr.mxu0 %v804_v0 }
  0x72   :  { %601 = vmatpush3.msra.mxu0 %v356_v57 }
  0x73   :  { %602 = vmatprep.subr.mxu0 %v804_v0 }
  0x74   :  { %603 = vmatpush3.msra.mxu0 %v355_v58 }
  0x75   :  { %604 = vmatprep.subr.mxu0 %v804_v0 }
  0x76   :  { %605 = vmatpush3.msra.mxu0 %v354_v59 }
  0x77   :  { %606 = vmatprep.subr.mxu0 %v804_v0 }
  0x78   :  { %607 = vmatpush3.msra.mxu0 %v353_v60 }
  0x79   :  { %608 = vmatprep.subr.mxu0 %v804_v0 }
  0x7a   :  { %609 = vmatpush3.msra.mxu0 %v352_v61 }
  0x7b   :  { %610 = vmatprep.subr.mxu0 %v804_v0 }
  0x7c   :  { %611 = vmatpush3.msra.mxu0 %v351_v62 }
  0x7d   :  { %612 = vmatprep.subr.mxu0 %v804_v0 }
  0x7e   :  { %613 = vmatpush3.msra.mxu0 %v350_v63 }
  0x7f   :  { %614 = vmatprep.subr.mxu0 %v804_v0 }
  0x80   :  { %615 = vmatpush3.msra.mxu0 %v349_v1 }
  0x81   :  { %616 = vmatprep.subr.mxu0 %v804_v0 }
  0x82   :  { %617 = vmatpush3.msra.mxu0 %v348_v2 }
  0x83   :  { %618 = vmatprep.subr.mxu0 %v804_v0 }
  0x84   :  { %619 = vmatpush3.msra.mxu0 %v347_v3 }
  0x85   :  { %620 = vmatprep.subr.mxu0 %v804_v0 }
  0x86   :  { %621 = vmatpush3.msra.mxu0 %v346_v4 }
  0x87   :  { %622 = vmatprep.subr.mxu0 %v804_v0 }
  0x88   :  { %623 = vmatpush3.msra.mxu0 %v345_v5 }
  0x89   :  { %624 = vmatprep.subr.mxu0 %v804_v0 }
  0x8a   :  { %625 = vmatpush3.msra.mxu0 %v344_v6 }
  0x8b   :  { %626 = vmatprep.subr.mxu0 %v804_v0 }
  0x8c   :  { %627 = vmatpush3.msra.mxu0 %v343_v7 }
  0x8d   :  { %629 = vmatmul.mubr.f32.vlgmr.msra.gmra.mxu0 %v104_v8 }
 0x12c   :  { %v200_v19 = vpop.f32.mrf.mxu0 }
 0x12d   :  { %v201_v20 = vadd.f32 %v466_v18, %v200_v19 }
 0x12e   :  { %v560_v21 = vpop.f32.mrf.mxu0 }
 0x12f   :  { %204 = vadd.xlane.f32.xlu0 %v201_v20 }
 0x14d   :  { %v429_v18 = vpop.f32.mrf.mxu0 }
 0x14e   :  { %v430_v26 = vadd.f32 %v472_v22, %v429_v18 }
 0x14f   :  { %v630_v0 = vpop.f32.mrf.mxu0 }
 0x1b8   :  { %v205_v27 = vpop.xlane.xlu0 %204 }
 0x1b9   :  { %v206_v28 = vmul.f32 0.03125, %v205_v27  ;;  %v471_v27 = vld [vmem:[%s962_s6 + $0x2] ss:$0 sm:$0xff] }
 0x1bb   :  { %v207_v29 = vsub.f32 %v201_v20, %v206_v28 }
 0x1bd   :  { %v211_v30 = vsel %vm210_vm1, %v207_v29, 0.0 }
 0x1be   :  { %v212_v31 = vmul.f32 %v211_v30, %v211_v30  ;;  %v433_v30 = vmax.f32 %v430_v26, 0.0 }
 0x1c0   :  { %213 = vadd.xlane.f32.xlu0 %v212_v31 }
 0x249   :  { %v214_v45 = vpop.xlane.xlu0 %213 }
 0x24a   :  { %v215_v46 = vmul.f32 0.03125, %v214_v45 }
 0x24c   :  { %v216_v47 = vadd.f32 1e-05, %v215_v46 }
 0x24e   :  { %642 = vrsqrt.f32 %v216_v47 }
 0x25b   :  { %v643_v48 = vpop.eup %642 }
 0x25c   :  { %v218_v50 = vmul.f32 %v643_v48, %v207_v29 }
 0x25e   :  { %v223_v52 = vmul.f32 %v467_v49, %v218_v50 }
 0x260   :  { %v228_v53 = vadd.f32 %v468_v51, %v223_v52 }
 0x262   :  { %v229_v54 = vmax.f32 %v228_v53, 0.0 }
 0x264   :  { %594 = vmatmul.mubr.f32.vlgmr.msra.gmra.mxu1 %v229_v54 }
 0x324   :  { %v316_v10 = vpop.f32.mrf.mxu1 }
 0x325   :  { %v317_v11 = vadd.f32 %v469_v9, %v316_v10 }
 0x326   :  { %v595_v12 = vpop.f32.mrf.mxu1 }
 0x327   :  { %320 = vadd.xlane.f32.xlu1 %v317_v11 }
 0x3b0   :  { %v321_v13 = vpop.xlane.xlu1 %320 }
 0x3b1   :  { %v322_v14 = vmul.f32 0.03125, %v321_v13 }
 0x3b3   :  { %v323_v15 = vsub.f32 %v317_v11, %v322_v14 }
 0x3b5   :  { %v324_v16 = vsel %vm210_vm1, %v323_v15, 0.0 }
 0x3b6   :  { %v325_v17 = vmul.f32 %v324_v16, %v324_v16 }
 0x3b8   :  { %326 = vadd.xlane.f32.xlu1 %v325_v17 }
 0x441   :  { %v327_v19 = vpop.xlane.xlu1 %326 }
 0x442   :  { %v328_v20 = vmul.f32 0.03125, %v327_v19 }
 0x444   :  { %v329_v21 = vadd.f32 1e-05, %v328_v20 }
 0x446   :  { %644 = vrsqrt.f32 %v329_v21 }
 0x453   :  { %v645_v23 = vpop.eup %644 }
 0x454   :  { %v331_v25 = vmul.f32 %v645_v23, %v323_v15 }
 0x456   :  { %v336_v28 = vmul.f32 %v470_v24, %v331_v25 }
 0x458   :  { %v341_v29 = vadd.f32 %v471_v27, %v336_v28 }
 0x45a   :  { %v342_v31 = vmax.f32 %v341_v29, 0.0 }
 0x45c   :  { %v434_v33 = vadd.f32 %v433_v30, %v342_v31 }
 0x45e   :  { %v439_v34 = vmul.f32 %v473_v32, %v434_v33 }
 0x460   :  { %440 = vadd.xlane.f32.xlu0 %v439_v34 }
 0x4e9   :  { %v441_v36 = vpop.xlane.xlu0 %440 }
 0x4ea   :  { %v446_v37 = vadd.f32 %v474_v35, %v441_v36 }
 0x4ec   :  { %447 = vst [vmem:[#allocation13] sm:$0xff] %v446_v37 }
 0x4ed   :  { %777 = shalt.err (!%p774_p6)
}
 0x4ee   :  { %457 = dma.vmem_to_hbm [thread:$0]  %s455_s16, 128, %s963_s7, [#allocation4]  }
 0x4ef   :  { %794 = dma.done.wait [#allocation4], 128  }
 0x4f0   :  { %795 = vsyncadd [#allocation4], 4294967168 }
 0x4f1   :  { %461 = vsyncpa [#allocation3], 1 }
 0x4f2   :  { %462 = vsyncpa [#allocation6], 1 }
 0x4f3   :  { %463 = vsyncpa [#allocation9], 1 }
 0x4f4   :  { %464 = vsyncpa [#allocation12], 1 }
 0x4f5   :  { %465 = vsyncpa [#allocation4], 1 }

</bundles_post_ra>
